<compile_context>
chip_gen: v5e
topology: v5e:2x2
jax: 0.10.0
libtpu: 0.0.40
codegen_flags: <defaults>
</compile_context>

<pallas_src>
import functools

import jax
import jax.numpy as jnp
import numpy as np
from jax import lax
from jax.experimental import pallas as pl
from jax.experimental.pallas import tpu as pltpu


def _round_up(x, m):
    return (x + m - 1) // m * m


def _vmem_capacity_bytes():
    try:
        return int(pltpu.get_tpu_info().vmem_capacity_bytes)
    except Exception:
        return 64 * 1024 * 1024  # conservative default (v7x per-TC VMEM)


# ----------------------------------------------------------------------------
# mean / sum : mask-as-matmul on the MXU, mask cached across hidden tiles.
# ----------------------------------------------------------------------------
def _build_mask(idx_ref, mask_ref):
    """mask[t, s] = (ori_indexes[s] == t) & (ori_indexes[s] >= 0), in hid dtype."""
    T, S = mask_ref.shape
    idx = idx_ref[0]                                            # (1, S)
    t_iota = lax.broadcasted_iota(jnp.int32, (T, S), 0)
    mask_ref[...] = jnp.logical_and(idx == t_iota, idx >= 0).astype(mask_ref.dtype)


def _sum_kernel(idx_ref, hid_ref, out_ref, mask_ref):
    # idx_ref : (1, 1, S_pad) int32, hid_ref : (1, S_pad, TH), out_ref : (1, T_pad, TH) f32
    @pl.when(pl.program_id(1) == 0)          # build mask once per batch row
    def _():
        _build_mask(idx_ref, mask_ref)
    out_ref[0] = jnp.dot(mask_ref[...], hid_ref[0],
                         preferred_element_type=jnp.float32)


def _mean_kernel(idx_ref, hid_ref, inv_ref, out_ref, mask_ref):
    # inv_ref : (1, T_pad, 1) f32 -- precomputed 1 / clamp(counts, 1)
    @pl.when(pl.program_id(1) == 0)
    def _():
        _build_mask(idx_ref, mask_ref)
    summed = jnp.dot(mask_ref[...], hid_ref[0],
                     preferred_element_type=jnp.float32)        # (T_pad, TH)
    out_ref[0] = summed * inv_ref[0]                            # broadcast over lanes


# ----------------------------------------------------------------------------
# max / min : SMEM-index-driven per-row scatter into the output block.
# ----------------------------------------------------------------------------
def _minmax_kernel(idx_ref, hid_ref, out_ref, *, mode, s_valid, s_stride):
    # idx_ref : (B * S_pad,) int32 in SMEM (scalar prefetch)
    # hid_ref : (1, S_pad, TH), out_ref : (1, T_pad, TH) f32
    b = pl.program_id(0)
    T = out_ref.shape[1]
    TH = out_ref.shape[2]
    fill = jnp.float32(-jnp.inf) if mode == "max" else jnp.float32(jnp.inf)
    out_ref[0] = jnp.full((T, TH), fill, dtype=jnp.float32)
    base = b * s_stride

    def body(s, carry):
        tok = idx_ref[base + s]              # scalar read off the SMEM path

        @pl.when(jnp.logical_and(tok >= 0, tok < T))
        def _():
            row = hid_ref[0, pl.ds(s, 1), :].astype(jnp.float32)   # (1, TH)
            cur = out_ref[0, pl.ds(tok, 1), :]                     # (1, TH)
            if mode == "max":
                out_ref[0, pl.ds(tok, 1), :] = jnp.maximum(cur, row)
            else:
                out_ref[0, pl.ds(tok, 1), :] = jnp.minimum(cur, row)

        return carry

    lax.fori_loop(0, s_valid, body, 0)


# ----------------------------------------------------------------------------
# Wrapper
# ----------------------------------------------------------------------------
def sequence_group_aggregating(hidden, ori_indexes, mode="mean", max_num_tokens=None):
    """JAX/Pallas equivalent of SequenceGroupAggregating.forward (f32 output)."""
    mode = mode.lower()
    assert mode in ("mean", "max", "sum", "min"), f"Mode {mode} is not supported!"

    hidden = jnp.asarray(hidden)
    if hidden.dtype not in (jnp.float32, jnp.bfloat16):
        hidden = hidden.astype(jnp.float32)
    ori_indexes = jnp.asarray(ori_indexes, jnp.int32)
    B, S, H = hidden.shape

    if max_num_tokens is None:
        # TODO(synk): this host sync mirrors `.item()` in PyTorch; callers that
        # know (or bucket) the token count should pass max_num_tokens to keep
        # dispatch fully asynchronous.
        max_num_tokens = int(jax.device_get(jnp.max(ori_indexes))) + 1
    T = int(max_num_tokens)
    if T <= 0:                               # whole batch is padding
        return jnp.zeros((B, 0, H), jnp.float32)

    T_pad = _round_up(T, 8)                  # sublane-aligned f32 stores
    H_pad = _round_up(H, 128)                # lane-dense (unmasked) stores
    hid_bytes = hidden.dtype.itemsize
    is_matmul = mode in ("mean", "sum")
    S_pad = _round_up(S, 128 if is_matmul else 8)   # 128-aligned matmul K dim

    if H_pad != H:
        hidden = jnp.pad(hidden, ((0, 0), (0, 0), (0, H_pad - H)))
    if S_pad != S:
        hidden = jnp.pad(hidden, ((0, 0), (0, S_pad - S), (0, 0)))
    idx_pad = ori_indexes
    if S_pad != S:
        idx_pad = jnp.pad(ori_indexes, ((0, 0), (0, S_pad - S)), constant_values=-1)

    # ---- VMEM-budgeted hidden-tile selection -------------------------------
    vmem_cap = _vmem_capacity_bytes()
    budget = max(24 << 20, int(vmem_cap * 0.6))          # tile-selection target
    vmem_limit = max(32 << 20, min(int(vmem_cap * 0.75), 100 << 20))

    def _vmem_need(th):
        need = 2 * S_pad * th * hid_bytes + 2 * T_pad * th * 4   # double-buffered hid + out
        need += T_pad * th * 4                                    # in-kernel f32 temp
        if is_matmul:
            need += T_pad * S_pad * (hid_bytes + 4)               # mask scratch + iota temp
            need += 2 * S_pad * 4 + 2 * T_pad * 4                 # idx / inv blocks
        return need

    cands = [d for d in range(128, H_pad + 1, 128) if H_pad % d == 0]
    fitting = [d for d in cands if _vmem_need(d) <= budget]
    if fitting:
        if H_pad in fitting:
            TH = H_pad                        # nH = 1: mask built & idx fetched once per batch
        else:
            TH = max(fitting, key=lambda d: (d % 256 == 0, d))   # prefer 256-mult (v6e/v7x MXU)
    else:
        TH = 128
    nH = H_pad // TH
    # TODO(synk): on v7x (2 TensorCores) with B == 1 and nH == 1, split T_pad over
    # a second parallel grid axis so both cores are used.

    if is_matmul:
        idx_in = idx_pad.reshape(B, 1, S_pad)             # lanes = sub-tokens
        in_specs = [
            pl.BlockSpec((1, 1, S_pad), lambda b, h: (b, 0, 0)),
            pl.BlockSpec((1, S_pad, TH), lambda b, h: (b, 0, h)),
        ]
        args = [idx_in, hidden]
        if mode == "mean":
            # Counts depend only on (B, T): compute them once outside the kernel.
            valid = (ori_indexes >= 0)
            clipped = jnp.where(valid, ori_indexes, 0)
            counts = jnp.zeros((B, T_pad), jnp.float32).at[
                jnp.arange(B)[:, None], clipped].add(valid.astype(jnp.float32))
            inv_counts = (1.0 / jnp.maximum(counts, 1.0)).reshape(B, T_pad, 1)
            in_specs.append(pl.BlockSpec((1, T_pad, 1), lambda b, h: (b, 0, 0)))
            args.append(inv_counts)
            kernel = _mean_kernel
        else:
            kernel = _sum_kernel

        out = pl.pallas_call(
            kernel,
            out_shape=jax.ShapeDtypeStruct((B, T_pad, H_pad), jnp.float32),
            grid=(B, nH),
            in_specs=in_specs,
            out_specs=pl.BlockSpec((1, T_pad, TH), lambda b, h: (b, 0, h)),
            scratch_shapes=[pltpu.VMEM((T_pad, S_pad), hidden.dtype)],  # cached mask
            compiler_params=pltpu.CompilerParams(
                # h must stay sequential when nH > 1 so the cached mask is valid.
                dimension_semantics=("parallel", "parallel" if nH == 1 else "arbitrary"),
                vmem_limit_bytes=vmem_limit),
        )(*args)
    else:
        idx_flat = idx_pad.reshape(B * S_pad)             # -> SMEM via scalar prefetch
        kernel = functools.partial(_minmax_kernel, mode=mode, s_valid=S, s_stride=S_pad)
        grid_spec = pltpu.PrefetchScalarGridSpec(
            num_scalar_prefetch=1,
            grid=(B, nH),
            in_specs=[pl.BlockSpec((1, S_pad, TH), lambda b, h, idx: (b, 0, h))],
            out_specs=pl.BlockSpec((1, T_pad, TH), lambda b, h, idx: (b, 0, h)),
        )
        out = pl.pallas_call(
            kernel,
            out_shape=jax.ShapeDtypeStruct((B, T_pad, H_pad), jnp.float32),
            grid_spec=grid_spec,
            compiler_params=pltpu.CompilerParams(
                dimension_semantics=("parallel", "parallel"),
                vmem_limit_bytes=vmem_limit),
        )(idx_flat, hidden)

    # TODO(synk): this slice is an HBM->HBM copy; fuse it into the consumer (or
    # keep the padded layout downstream) when this op is memory-bound.
    return out[:, :T, :H]


# ----------------------------------------------------------------------------
# Pure-JAX reference mirroring the PyTorch forward (for verification).
# ----------------------------------------------------------------------------
def _reference(hidden, ori_indexes, mode):
    hidden = jnp.asarray(hidden, jnp.float32)
    ori_indexes = jnp.asarray(ori_indexes, jnp.int32)
    T = int(jax.device_get(jnp.max(ori_indexes))) + 1
    mask = jnp.logical_and(
        ori_indexes[:, :, None] == jnp.arange(T)[None, None, :],
        ori_indexes[:, :, None] >= 0,
    )  # (B, S, T)
    maskf = mask.astype(jnp.float32)
    if mode in ("mean", "sum"):
        summed = jnp.einsum("bst,bsh->bth", maskf, hidden)
        if mode == "sum":
            return summed
        counts = jnp.maximum(maskf.sum(axis=1), 1.0)[:, :, None]
        return summed / counts
    fill = -jnp.inf if mode == "max" else jnp.inf
    masked = jnp.where(mask[:, :, :, None], hidden[:, :, None, :], fill)
    return jnp.max(masked, axis=1) if mode == "max" else jnp.min(masked, axis=1)


if __name__ == "__main__":
    ok = True

    # Small deterministic example: batch=2, num_sub_tokens=8, hid_dim=32 (f32).
    key = jax.random.PRNGKey(0)
    B, S, H = 2, 8, 32
    hidden = jax.random.normal(key, (B, S, H), dtype=jnp.float32)
    ori_indexes = jnp.array(
        [
            [0, 0, 1, 2, 2, 2, 3, -1],   # -1 = padding sub-token (ignored)
            [0, 1, 1, 2, 3, 3, 4, 4],
        ],
        dtype=jnp.int32,
    )
    for mode in ("mean", "sum", "max", "min"):
        out = jax.block_until_ready(
            sequence_group_aggregating(hidden, ori_indexes, mode=mode))
        ref = _reference(hidden, ori_indexes, mode)
        if not np.allclose(np.asarray(out), np.asarray(ref), atol=1e-5, rtol=1e-5):
            ok = False
            print(f"mismatch in f32 mode={mode}")

    # bf16 hidden path (dtype preserved end-to-end; exact for the 0/1 mask matmul).
    key2 = jax.random.PRNGKey(1)
    hid_bf16 = jax.random.normal(key2, (2, 16, 256), dtype=jnp.float32).astype(jnp.bfloat16)
    idx2 = jnp.array(
        [
            [0, 0, 0, 1, 1, 2, 3, 3, 4, 4, 4, 5, 6, 6, 7, -1],
            [0, 1, 2, 2, 3, 3, 3, 4, 5, 5, 6, 7, 7, 8, 9, 9],
        ],
        dtype=jnp.int32,
    )
    for mode in ("mean", "sum", "max", "min"):
        out = jax.block_until_ready(
            sequence_group_aggregating(hid_bf16, idx2, mode=mode))
        ref = _reference(hid_bf16, idx2, mode)
        if not np.allclose(np.asarray(out), np.asarray(ref), atol=1e-4, rtol=1e-4):
            ok = False
            print(f"mismatch in bf16 mode={mode}")

    if ok:
        print("KERNEL_OK")
</pallas_src>

<mosaic_0001>
module attributes {stable_mosaic.version = 11 : i64} {
  func.func @_mean_kernel(%arg0: i32, %arg1: i32, %arg2: memref<1x1x128xi32, #tpu.memory_space<vmem>>, %arg3: memref<1x128x128xf32, #tpu.memory_space<vmem>>, %arg4: memref<1x8x1xf32, #tpu.memory_space<vmem>>, %arg5: memref<1x8x128xf32, #tpu.memory_space<vmem>>, %arg6: memref<8x128xf32, #tpu.memory_space<vmem>>) attributes {dimension_semantics = [#tpu.dimension_semantics<parallel>, #tpu.dimension_semantics<parallel>], iteration_bounds = array<i64: 2, 1>, scalar_prefetch = 0 : i64, scratch_operands = 1 : i64, tpu.core_type = #tpu.core_type<tc>, window_params = [{transform_indices = @transform_0, window_bounds = array<i64: 1, 1, 128>}, {transform_indices = @transform_1, window_bounds = array<i64: 1, 128, 128>}, {transform_indices = @transform_2, window_bounds = array<i64: 1, 8, 1>}, {transform_indices = @transform_3, window_bounds = array<i64: 1, 8, 128>}]} {
    %c0_i32 = arith.constant 0 : i32
    %0 = arith.cmpi eq, %arg1, %c0_i32 : i32
    %1 = arith.extui %0 : i1 to i32
    %c0_i32_0 = arith.constant 0 : i32
    %2 = arith.cmpi ne, %1, %c0_i32_0 : i32
    scf.if %2 {
      %c0_11 = arith.constant 0 : index
      %c0_12 = arith.constant 0 : index
      %c0_13 = arith.constant 0 : index
      %14 = vector.load %arg2[%c0_11, %c0_12, %c0_13] : memref<1x1x128xi32, #tpu.memory_space<vmem>>, vector<1x1x128xi32>
      %15 = vector.shape_cast %14 : vector<1x1x128xi32> to vector<1x128xi32>
      %16 = tpu.iota {dimensions = array<i32: 0>} : vector<8x128xi32>
      %17 = vector.broadcast %15 : vector<1x128xi32> to vector<8x128xi32>
      %18 = arith.cmpi eq, %17, %16 : vector<8x128xi32>
      %c0_i32_14 = arith.constant 0 : i32
      %19 = vector.broadcast %c0_i32_14 : i32 to vector<1x128xi32>
      %20 = arith.cmpi sge, %15, %19 : vector<1x128xi32>
      %21 = vector.broadcast %20 : vector<1x128xi1> to vector<8x128xi1>
      %22 = arith.andi %18, %21 : vector<8x128xi1>
      %23 = arith.extui %22 : vector<8x128xi1> to vector<8x128xi32>
      %24 = arith.sitofp %23 : vector<8x128xi32> to vector<8x128xf32>
      %c0_15 = arith.constant 0 : index
      %c0_16 = arith.constant 0 : index
      %25 = vector.load %arg6[%c0_15, %c0_16] : memref<8x128xf32, #tpu.memory_space<vmem>>, vector<8x128xf32>
      tpu.vector_store %arg6[%c0_15, %c0_16], %24 {strides = array<i32>} : memref<8x128xf32, #tpu.memory_space<vmem>>, vector<8x128xf32>,
    } else {
    }
    %c0 = arith.constant 0 : index
    %c0_1 = arith.constant 0 : index
    %3 = vector.load %arg6[%c0, %c0_1] : memref<8x128xf32, #tpu.memory_space<vmem>>, vector<8x128xf32>
    %c0_2 = arith.constant 0 : index
    %c0_3 = arith.constant 0 : index
    %c0_4 = arith.constant 0 : index
    %4 = vector.load %arg3[%c0_2, %c0_3, %c0_4] : memref<1x128x128xf32, #tpu.memory_space<vmem>>, vector<1x128x128xf32>
    %5 = vector.shape_cast %4 : vector<1x128x128xf32> to vector<128x128xf32>
    %cst = arith.constant dense<0.000000e+00> : vector<8x128xf32>
    %6 = tpu.matmul %3, %5, %cst {dimension_numbers = #tpu.dot_dimension_numbers<[1], [0], [0], [1], [0, 0, 1, 1], [], []>} : vector<8x128xf32>, vector<128x128xf32>, vector<8x128xf32> -> vector<8x128xf32>
    %c0_5 = arith.constant 0 : index
    %c0_6 = arith.constant 0 : index
    %c0_7 = arith.constant 0 : index
    %7 = vector.load %arg4[%c0_5, %c0_6, %c0_7] : memref<1x8x1xf32, #tpu.memory_space<vmem>>, vector<1x8x1xf32>
    %8 = vector.shape_cast %7 : vector<1x8x1xf32> to vector<8x1xf32>
    %9 = vector.broadcast %8 : vector<8x1xf32> to vector<8x128xf32>
    %10 = arith.mulf %6, %9 : vector<8x128xf32>
    %c0_8 = arith.constant 0 : index
    %c0_9 = arith.constant 0 : index
    %c0_10 = arith.constant 0 : index
    %11 = vector.load %arg5[%c0_8, %c0_9, %c0_10] : memref<1x8x128xf32, #tpu.memory_space<vmem>>, vector<1x8x128xf32>
    %12 = vector.shape_cast %11 : vector<1x8x128xf32> to vector<8x128xf32>
    %13 = vector.shape_cast %10 : vector<8x128xf32> to vector<1x8x128xf32>
    tpu.vector_store %arg5[%c0_8, %c0_9, %c0_10], %13 {strides = array<i32>} : memref<1x8x128xf32, #tpu.memory_space<vmem>>, vector<1x8x128xf32>,
    return
  }
  func.func @transform_0(%arg0: i32, %arg1: i32) -> (i32, i32, i32) {
    %c0_i32 = arith.constant 0 : i32
    %c0_i32_0 = arith.constant 0 : i32
    %c0_i32_1 = arith.constant 0 : i32
    return %arg0, %c0_i32, %c0_i32_0 : i32, i32, i32
  }
  func.func @transform_1(%arg0: i32, %arg1: i32) -> (i32, i32, i32) {
    %c0_i32 = arith.constant 0 : i32
    %c0_i32_0 = arith.constant 0 : i32
    return %arg0, %c0_i32, %arg1 : i32, i32, i32
  }
  func.func @transform_2(%arg0: i32, %arg1: i32) -> (i32, i32, i32) {
    %c0_i32 = arith.constant 0 : i32
    %c0_i32_0 = arith.constant 0 : i32
    %c0_i32_1 = arith.constant 0 : i32
    return %arg0, %c0_i32, %c0_i32_0 : i32, i32, i32
  }
  func.func @transform_3(%arg0: i32, %arg1: i32) -> (i32, i32, i32) {
    %c0_i32 = arith.constant 0 : i32
    %c0_i32_0 = arith.constant 0 : i32
    return %arg0, %c0_i32, %arg1 : i32, i32, i32
  }
}

</mosaic_0001>

<bundles_post_ra>
// kernel: tpu_custom_call.1
= control target key start
LH: loop header
LB: loop body
LE: loop exit
PB: predicated region body
PF: predicated region fallthrough
CT: control target
= control target key end

     0   :  { %8 = vsyncpa [#allocation4], 0  ;;  %s791_s0 = inlined_call_operand.vmem [shape: s32[2,1,128], index: 0, kind: input, shape index: {}]   ;;  %s792_s1 = inlined_call_operand.hbm [shape: f32[2,128,128], index: 1, kind: input, shape index: {}]   ;;  %s793_s2 = inlined_call_operand.vmem [shape: f32[2,8,1], index: 2, kind: input, shape index: {}]   ;;  %s794_s3 = inlined_call_operand.hbm [shape: f32[2,8,128], index: 3, kind: output, shape index: {}]  }
   0x1   :  { %10 = vsyncpa [#allocation4 + $0x1], 0 }
   0x2   :  { %11 = vsyncpa [#allocation5], 0 }
   0x3   :  { %13 = vsyncpa [#allocation5 + $0x1], 0  ;;  %s644_s12 = smov 0   ;;  %s646_s13 = smov 0  }
   0x4   :  { %s648_s14 = smov 0   ;;  %s650_s15 = smov 0  }
   0x5   :  { %s652_s16 = smov 0   ;;  %s654_s17 = smov 0  }
   0x6 LB: > { %s420_s18 = sadd.s32 4294967295, %s618_s17   ;;  %s421_s19 = sadd.s32 4294967294, %s618_s17   ;;  %s618_s17 = sphi %s654_s17, %s19_s17   ;;  %s614_s16 = sphi %s652_s16, %s803_s16   ;;  %s610_s15 = sphi %s650_s15, %s802_s15   ;;  %s606_s14 = sphi %s648_s14, %s801_s14   ;;  %s602_s13 = sphi %s646_s13, %s800_s13   ;;  %s598_s12 = sphi %s644_s12, %s799_s12  }
   0x7   : > { %s31_s20 = sadd.s32 1, %s614_s16  ;;  %s66_s21 = sadd.s32 1, %s606_s14 }
   0x8   : > { %p33_p0 = scmp.ge.s32.totalorder %s31_s20, 2  ;;  %p73_p1 = scmp.ne.s32.totalorder %s606_s14, %s602_s13 }
   0x9   : > { %p74_p2 = scmp.eq.s32.totalorder %s618_s17, 0  ;;  %p79_p3 = scmp.ne.s32.totalorder %s602_s13, %s598_s12 }
   0xa   : > { %s805_s20 = smov (%p33_p0, %s31_s20), 0  ;;  %p80_p5 = scmp.eq.s32.totalorder %s420_s18, 0 }
   0xb   : > { %p685_p4 = por %p74_p2, %p73_p1  ;;  %s61_s23 = ssub.s32 %s614_s16, %s805_s20 }
   0xc   : > { %p131_p6 = scmp.eq.s32.totalorder %s420_s18, 1  ;;  %p64_p7 = scmp.eq.s32.totalorder %s61_s23, 0 }
   0xd   : > { %p691_p8 = por %p80_p5, %p79_p3  ;;  %p137_p10 = scmp.eq.s32.totalorder %s421_s19, 1 }
   0xe   : > { %p695_p9 = por %p131_p6, %p73_p1  ;;  %p423_p12 = scmp.ge.s32.totalorder %s618_s17, 2 }
   0xf   : > { %s700_s26 = scalar_select %p64_p7, %s606_s14, %s66_s21  }
  0x10   : > { %p702_p11 = por %p137_p10, %p79_p3  ;;  %p450_p13 = scmp.lt.s32.totalorder %s618_s17, 2 }
  0x11   : > { %s163_s28 = sand.u32 1, %s606_s14   ;;  %s436_s30 = sshll.u32 %s614_s16, 7 }
  0x12   : > { %s424_s29 = sshll.u32 %s163_s28, 7  ;;  %s173_s6 = scalar_lea.hbm %s792_s1, %s436_s30 }
  0x13   : > { %s167_s7 = scalar_lea.vmem [#allocation3], %s424_s29  ;;  %s174_s9 = sshll.u32 %s173_s6, 4  ;;  %s175_s9 = int_to_ptr.hbm [resolvable:$true] %s174_s9 }
  0x14   : > { %s176_s8 = sshll.u32 %s167_s7, 4  ;;  %p443_p0 = pnand %p450_p13, %p685_p4  ;;  %s177_s8 = int_to_ptr.vmem [resolvable:$true] %s176_s8 }
  0x15   : > { %p427_p1 = scmp.ge.s32.totalorder %s618_s17, 1  ;;  %s164_s10 = scalar_lea.sflag [#allocation4], %s163_s28 }
  0x16   : > { %s620_s11 = smov 128   ;;  %s621_s18 = smov 8  }
  0x17   : > { %445 = dma.hbm_to_vmem [thread:$0]  (!%p443_p0), %s175_s9, 2048, %s177_s8, %s164_s10, %s620_s11, %s620_s11, %s621_s18  }
  0x18   : > { %p191_p2 = scmp.lt.s32.totalorder %s618_s17, 3 }
  0x1a   : > { %p192_p3 = pnand %p427_p1, %p191_p2 }
  0x1b   : > { %s718_s19 = sand.u32 (!%p192_p3), 1, %s602_s13  }
  0x1c   : > { %195 = sbr.rel (%p192_p3) target bundleno = 197 (0xc5), region = 32  ;;  %s428_s21 = sshll.u32 (!%p192_p3), %s718_s19, 7 }
  0x1d   : > { %s198_s23 = scalar_lea.sflag (!%p192_p3), [#allocation4], %s718_s19  ;;  %s722_s29 = scalar_lea.vmem (!%p192_p3), [#allocation3], %s428_s21 }
  0x21   : > { %589 = dma.done.wait (%p691_p8), %s198_s23, 2048  }
  0x22   : > { %591 = vsyncadd (%p691_p8), %s198_s23, 4294965248  ;;  %p232_p4 = scmp.lt.s32.totalorder %s610_s15, 1  ;;  %v622_v0 = vmov 0   ;;  %v272_v1 = vld [vmem:[%s722_s29 + $0x78] sm:$0xff]  ;;  %v271_v2 = vld [vmem:[%s722_s29 + $0x70] sm:$0xff]  ;;  %v244_v14 = vlaneseq  ;;  %v623_v24 = vmov 1.0  }
  0x23   : > { %504 = vset.pattern.permute.xlu0 %v622_v0  ;;  %273 = vmatpush.msra.mxu0 %v272_v1  ;;  %v270_v3 = vld [vmem:[%s722_s29 + $0x68] sm:$0xff]  ;;  %v269_v4 = vld [vmem:[%s722_s29 + $0x60] sm:$0xff]  ;;  %v268_v5 = vld [vmem:[%s722_s29 + $0x58] sm:$0xff]  ;;  %s429_s8 = sshll.u32 %s718_s19, 3  ;;  %s433_s9 = sshll.u32 %s610_s15, 3 }
  0x24   : > { %s233_s22 = scalar_select %p232_p4, %s610_s15, 1  ;;  %v267_v7 = vld [vmem:[%s722_s29 + $0x50] sm:$0xff]  ;;  %v266_v8 = vld [vmem:[%s722_s29 + $0x48] sm:$0xff]  ;;  %v265_v9 = vld [vmem:[%s722_s29 + $0x40] sm:$0xff]  ;;  %v245_v18 = vshrl.u32 %v244_v14, 7 }
  0x25   : > { %274 = vmatpush.msra.mxu0 %v271_v2  ;;  %v264_v11 = vld [vmem:[%s722_s29 + $0x38] sm:$0xff]  ;;  %v263_v12 = vld [vmem:[%s722_s29 + $0x30] sm:$0xff]  ;;  %v262_v13 = vld [vmem:[%s722_s29 + $0x28] sm:$0xff]  ;;  %s313_s18 = scalar_lea.hbm %s794_s3, %s433_s9  ;;  %s231_s21 = scalar_lea.vmem [#allocation6], %s429_s8 }
  0x26   : > { %s430_s28 = sshll.u32 %s233_s22, 3  ;;  %s234_s7 = scalar_lea.vmem %s791_s0, %s233_s22  ;;  %v261_v16 = vld [vmem:[%s722_s29 + $0x20] sm:$0xff]  ;;  %v260_v17 = vld [vmem:[%s722_s29 + $0x18] sm:$0xff]  ;;  %v259_v21 = vld [vmem:[%s722_s29 + $0x10] sm:$0xff] }
  0x27   : > { %s238_s4 = scalar_lea.vmem %s793_s2, %s430_s28  ;;  %275 = vmatpush.msra.mxu0 %v270_v3  ;;  %v243_v10 = vld [vmem:[%s234_s7] sm:$0x1]  ;;  %v258_v22 = vld [vmem:[%s722_s29 + $0x8] sm:$0xff]  ;;  %s315_s23 = sshll.u32 %s231_s21, 4  ;;  %s316_s23 = int_to_ptr.vmem [resolvable:$true] %s315_s23 }
  0x28   : > { %v293_v6 = vld [vmem:[%s238_s4] sm:$0xff]  ;;  %vm248_vm0 = vcmp.ge.s32.totalorder %v243_v10, 0  ;;  %s317_s22 = sshll.u32 %s313_s18, 4  ;;  %s556_s4 = scalar_lea.hbm %s794_s3, 16  ;;  %s318_s22 = int_to_ptr.hbm [resolvable:$true] %s317_s22 }
  0x29   : > { %276 = vmatpush.msra.mxu0 %v269_v4  ;;  %296 = vperm.xlu0 %504, %v293_v6   ;;  %v249_v15 = vsel %vm248_vm0, 1, %v622_v0  ;;  %v505_v19 = vld [vmem:[%s234_s7] ss:$0 sm:$0xff]  ;;  %s550_s28 = sshra.s32 %s318_s22, 4  ;;  %s551_s28 = int_to_ptr.hbm [resolvable:$true] %s550_s28 }
  0x2a   : > { %v250_v20 = vperm.slane %v249_v15, 0  ;;  %vm247_vm1 = vcmp.eq.s32.totalorder %v505_v19, %v245_v18  ;;  %v257_v23 = vld [vmem:[%s722_s29] sm:$0xff]  ;;  %s302_s29 = scalar_lea.sflag [#allocation5], %s718_s19  ;;  %s552_s24 = scalar_lea.hbm %s551_s28, 8 }
  0x2b   : > { %277 = vmatpush.msra.mxu0 %v268_v5  ;;  %p553_p5 = scmp.ne.s32.totalorder %s551_s28, %s552_s24  ;;  %p557_p8 = scmp.lt.s32.totalorder %s551_s28, %s794_s3 }
  0x2c   : > { %vm251_vm2 = vcmp.eq.s32.totalorder %v250_v20, 1  ;;  %p558_p10 = scmp.lt.s32.totalorder %s556_s4, %s552_s24 }
  0x2d   : > { %278 = vmatpush.msra.mxu0 %v267_v7  ;;  %vm252_vm3 = vmand %vm247_vm1, %vm251_vm2  ;;  %p554_p6 = pnand %p553_p5, %p695_p9 }
  0x2e   : > { %p559_p13 = por %p558_p10, %p557_p8 }
  0x2f   : > { %279 = vmatpush.msra.mxu0 %v266_v8  ;;  %p555_p7 = pneg %p554_p6 }
  0x31   : > { %280 = vmatpush.msra.mxu0 %v265_v9  ;;  %p560_p0 = pnand %p559_p13, %p555_p7 }
  0x33   : > { %281 = vmatpush.msra.mxu0 %v264_v11 }
  0x35   : > { %282 = vmatpush.msra.mxu0 %v263_v12 }
  0x37   : > { %283 = vmatpush.msra.mxu0 %v262_v13 }
  0x39   : > { %284 = vmatpush.msra.mxu0 %v261_v16 }
  0x3b   : > { %285 = vmatpush.msra.mxu0 %v260_v17 }
  0x3d   : > { %286 = vmatpush.msra.mxu0 %v259_v21 }
  0x3f   : > { %287 = vmatpush.msra.mxu0 %v258_v22 }
  0x41   : > { %288 = vmatpush.msra.mxu0 %v257_v23 }
  0x42   : > { %437 = vmatmul.msk.f32.vlgmr.msra.gmra.mxu0 %vm252_vm3, %v623_v24 }
  0x9b   : > { %v297_v25 = vpop.permute.xlu0 %296 }
  0xbf   : > { %v290_v26 = vpop.f32.mrf.mxu0 }
  0xc0   : > { %v299_v27 = vmul.f32 %v297_v25, %v290_v26 }
  0xc2   : > { %300 = vst [vmem:[%s231_s21] sm:$0xff] %v299_v27 }
  0xc3   : > { %563 = shalt.err (!%p560_p0)
}
  0xc4   : > { %440 = dma.vmem_to_hbm [thread:$0]  (%p695_p9), %s316_s23, 128, %s318_s22, %s302_s29  }
  0xc5 PF: > { %s329_s19 = sand.u32 1, %s598_s12   ;;  %p447_p1 = pnand %p423_p12, %p702_p11 }
  0xc6   : > { %s330_s7 = scalar_lea.sflag [#allocation5], %s329_s19 }
  0xc7   : > { %p448_p2 = pneg %p447_p1 }
  0xc9   : > { %593 = dma.done.wait (%p448_p2), %s330_s7, 128  }
  0xca   : > { %595 = vsyncadd (%p448_p2), %s330_s7, 4294967168  ;;  %s19_s17 = sadd.s32 1, %s618_s17   ;;  %s799_s12 = smov %s602_s13 }
  0xcb   : > { %p16_p3 = scmp.ge.s32.totalorder %s19_s17, 4   ;;  %s800_s13 = smov %s606_s14 }
  0xcc   : > { %s801_s14 = smov %s700_s26  ;;  %s802_s15 = smov %s614_s16 }
  0xcd   : > { %s803_s16 = smov %s805_s20  ;;  %18 = sbr.rel (!%p16_p3) target bundleno = 6 (0x6), region = 87 }
  0xd2   :  { %336 = vsyncpa [#allocation4], 1 }
  0xd3   :  { %338 = vsyncpa [#allocation4 + $0x1], 1 }
  0xd4   :  { %339 = vsyncpa [#allocation5], 1 }
  0xd5   :  { %341 = vsyncpa [#allocation5 + $0x1], 1 }

</bundles_post_ra>
